<compile_context>
chip_gen: v7x
topology: tpu7x:2x2x1
jax: 0.10.0
libtpu: 0.0.40
codegen_flags: <defaults>
</compile_context>

<pallas_src>
import jax
import jax.numpy as jnp
from jax.experimental import pallas as pl
from jax.experimental.pallas import tpu as pltpu

LANE = 128


def _round_up(x, m):
    return -(-x // m) * m


# ----------------------------------------------------------------------------
# Fused decoder-head Pallas kernel:
#   out = relu( relu(z @ Wfc + bfc) @ Wd + bd )
# where Wd is ConvTranspose2d(256, 64, 4) flattened to a (256, 1024) matrix
# (valid because the spatial input is 1x1).
# ----------------------------------------------------------------------------
def _decoder_head_kernel(z_ref, wfc_ref, bfc_ref, wd_ref, bd_ref, o_ref):
    # Linear + (metadata-only View) + ReLU
    h = jnp.dot(z_ref[...], wfc_ref[...], preferred_element_type=jnp.float32)
    h = jnp.maximum(h + bfc_ref[...], 0.0)
    # ConvTranspose2d(256, 64, 4) on a 1x1 input == matmul, then ReLU
    y = jnp.dot(h.astype(wd_ref.dtype), wd_ref[...],
                preferred_element_type=jnp.float32)
    y = jnp.maximum(y + bd_ref[...], 0.0)
    o_ref[...] = y.astype(o_ref.dtype)


def fused_decoder_head(z, wfc_t, bfc, wd, bd):
    """relu(relu(z @ wfc_t + bfc) @ wd + bd), computed in one Pallas call.

    z:      (B, z_dim)
    wfc_t:  (K_pad, 256)  — Linear weight, transposed, zero-padded over K
    bfc:    (1, 256)
    wd:     (256, N)      — first ConvTranspose2d as a matmul, (y,x,o) flattened
    bd:     (1, N)
    Returns (B, N).
    """
    B, zdim = z.shape
    K_pad = wfc_t.shape[0]
    N = wd.shape[1]
    dtype = z.dtype

    # Zero-pad z's feature axis to the lane-aligned K_pad and its batch axis
    # to a sublane-aligned tile size; zero rows/cols do not change the matmul.
    tb = min(128, _round_up(B, 8))
    B_pad = _round_up(B, tb)
    z_pad = jnp.zeros((B_pad, K_pad), dtype).at[:B, :zdim].set(z)

    out = pl.pallas_call(
        _decoder_head_kernel,
        out_shape=jax.ShapeDtypeStruct((B_pad, N), dtype),
        grid=(B_pad // tb,),
        in_specs=[
            pl.BlockSpec((tb, K_pad), lambda i: (i, 0)),    # z tile
            pl.BlockSpec((K_pad, 256), lambda i: (0, 0)),   # Wfc (resident)
            pl.BlockSpec((1, 256), lambda i: (0, 0)),       # bfc
            pl.BlockSpec((256, N), lambda i: (0, 0)),       # Wd (resident)
            pl.BlockSpec((1, N), lambda i: (0, 0)),         # bd
        ],
        out_specs=pl.BlockSpec((tb, N), lambda i: (i, 0)),
        compiler_params=pltpu.CompilerParams(
            dimension_semantics=("parallel",)),
    )(z_pad, wfc_t, bfc, wd, bd)
    return out[:B]


# ----------------------------------------------------------------------------
# View (torch.Tensor.view) — metadata-only, never copies (per perf review).
# ----------------------------------------------------------------------------
class View:
    def __init__(self, size):
        self.size = size

    def __call__(self, tensor):
        return jnp.reshape(tensor, self.size)


# ----------------------------------------------------------------------------
# VisualReceiver decoder
# ----------------------------------------------------------------------------
class VisualReceiver:
    """JAX mirror of the PyTorch VisualReceiver.

    The head (Linear -> View -> ReLU -> ConvTranspose2d(256,64,4) -> ReLU) runs
    as one fused Pallas kernel; the remaining transposed convs run through XLA
    in NHWC layout.
    """

    def __init__(self, key, z_dim=10, channels=1, dtype=jnp.float32):
        self.z_dim = z_dim
        self.channels = channels
        keys = jax.random.split(key, 6)

        def kaiming(k, shape, fan_in):
            return jax.random.normal(k, shape, dtype) * jnp.sqrt(2.0 / fan_in)

        # Linear(z_dim, 256), torch (out, in) layout; stored transposed and
        # zero-padded to a lane-aligned contraction dim for the Pallas kernel.
        k_pad = _round_up(max(z_dim, 1), LANE)
        w_fc = kaiming(keys[0], (256, z_dim), z_dim)
        self.w_fc_t = jnp.zeros((k_pad, 256), dtype).at[:z_dim, :].set(w_fc.T)
        self.b_fc = jnp.zeros((1, 256), dtype)

        # ConvTranspose2d(256, 64, 4) on a 1x1 input:
        #   out[b, y, x, o] = bias[o] + sum_c in[b, c] * W[c, o, y, x]
        # Flatten to (256, 4*4*64) with (y, x, o) order so the kernel output
        # reshapes directly into NHWC.
        w_ct1 = kaiming(keys[1], (256, 64, 4, 4), 256)       # torch (in,out,kh,kw)
        self.w_d = jnp.transpose(w_ct1, (0, 2, 3, 1)).reshape(256, 4 * 4 * 64)
        self.b_d = jnp.zeros((1, 4 * 4 * 64), dtype)

        # Remaining transposed convs, NHWC / HWIO layout.
        cfg = [
            (64, 64, 4, 2, 1),
            (64, 32, 4, 2, 1),
            (32, 32, 4, 2, 1),
            (32, channels, 4, 2, 1),
        ]
        self.convs = []
        for k, (cin, cout, ksz, stride, pad) in zip(keys[2:], cfg):
            w = kaiming(k, (ksz, ksz, cin, cout), cin * ksz * ksz)
            b = jnp.zeros((cout,), dtype)
            self.convs.append((w, b, ksz, stride, pad))

    @staticmethod
    def _conv_transpose_nhwc(x, w, b, ksz, stride, pad):
        # TODO(synk): ConvTranspose2d layers 2..5 and their ReLUs run through
        # XLA (lax.conv_general_dilated) rather than hand-written Pallas.
        # NOTE: lax conv is a correlation (no spatial flip); porting trained
        # torch ConvTranspose2d weights would require flipping kH/kW and
        # swapping the in/out channel axes.
        y = jax.lax.conv_general_dilated(
            x, w,
            window_strides=(1, 1),
            padding=[(ksz - 1 - pad, ksz - 1 - pad)] * 2,
            lhs_dilation=(stride, stride),
            dimension_numbers=("NHWC", "HWIO", "NHWC"),
            preferred_element_type=jnp.float32,
        )
        return y + b[None, None, None, :]

    def __call__(self, z):
        # Fused Pallas head: Linear -> View -> ReLU -> ConvT(256,64,4) -> ReLU.
        h = fused_decoder_head(z, self.w_fc_t, self.b_fc, self.w_d, self.b_d)
        h = h.reshape(z.shape[0], 4, 4, 64)                  # NHWC, (B,4,4,64)
        for i, (w, b, ksz, s, p) in enumerate(self.convs):
            h = self._conv_transpose_nhwc(h, w, b, ksz, s, p)
            if i < len(self.convs) - 1:
                h = jax.nn.relu(h)
        # Match the PyTorch module's NCHW output layout.
        return jnp.transpose(h, (0, 3, 1, 2))                # (B, channels, 64, 64)


if __name__ == "__main__":
    key = jax.random.PRNGKey(0)
    k_model, k_z, k_zbig = jax.random.split(key, 3)

    model = VisualReceiver(k_model, z_dim=10, channels=1)
    z = jax.random.normal(k_z, (2, 10), dtype=jnp.float32)

    # Pure-JAX reference for the fused Pallas head.
    def head_ref(zz):
        h = jnp.maximum(zz @ model.w_fc_t[: zz.shape[1]] + model.b_fc, 0.0)
        return jnp.maximum(h @ model.w_d + model.b_d, 0.0)

    # 1) Fused Pallas head, single grid step (B=2).
    head = jax.block_until_ready(
        fused_decoder_head(z, model.w_fc_t, model.b_fc, model.w_d, model.b_d))
    assert head.shape == (2, 4 * 4 * 64), head.shape
    assert bool(jnp.allclose(head, head_ref(z), atol=1e-4, rtol=1e-4))

    # 2) Full VisualReceiver forward.
    img = jax.block_until_ready(model(z))
    assert img.shape == (2, 1, 64, 64), img.shape
    assert bool(jnp.all(jnp.isfinite(img)))

    # 3) Larger batch -> multiple parallel grid steps over the batch tiles.
    zb = jax.random.normal(k_zbig, (200, 10), dtype=jnp.float32)
    headb = jax.block_until_ready(
        fused_decoder_head(zb, model.w_fc_t, model.b_fc, model.w_d, model.b_d))
    assert headb.shape == (200, 4 * 4 * 64), headb.shape
    assert bool(jnp.allclose(headb, head_ref(zb), atol=1e-4, rtol=1e-4))

    print("KERNEL_OK")
</pallas_src>

<mosaic_0001>
module attributes {stable_mosaic.version = 11 : i64} {
  func.func @_decoder_head_kernel(%arg0: i32, %arg1: memref<8x128xf32, #tpu.memory_space<vmem>>, %arg2: memref<128x256xf32, #tpu.memory_space<vmem>>, %arg3: memref<1x256xf32, #tpu.memory_space<vmem>>, %arg4: memref<256x1024xf32, #tpu.memory_space<vmem>>, %arg5: memref<1x1024xf32, #tpu.memory_space<vmem>>, %arg6: memref<8x1024xf32, #tpu.memory_space<vmem>>) attributes {dimension_semantics = [#tpu.dimension_semantics<parallel>], iteration_bounds = array<i64: 1>, scalar_prefetch = 0 : i64, scratch_operands = 0 : i64, tpu.core_type = #tpu.core_type<tc>, window_params = [{transform_indices = @transform_0, window_bounds = array<i64: 8, 128>}, {pipeline_mode = #tpu.pipeline_mode<synchronous>, transform_indices = @transform_1, window_bounds = array<i64: 128, 256>}, {pipeline_mode = #tpu.pipeline_mode<synchronous>, transform_indices = @transform_2, window_bounds = array<i64: 1, 256>}, {pipeline_mode = #tpu.pipeline_mode<synchronous>, transform_indices = @transform_3, window_bounds = array<i64: 256, 1024>}, {pipeline_mode = #tpu.pipeline_mode<synchronous>, transform_indices = @transform_4, window_bounds = array<i64: 1, 1024>}, {transform_indices = @transform_5, window_bounds = array<i64: 8, 1024>}]} {
    %c0 = arith.constant 0 : index
    %c0_0 = arith.constant 0 : index
    %0 = vector.load %arg1[%c0, %c0_0] : memref<8x128xf32, #tpu.memory_space<vmem>>, vector<8x128xf32>
    %c0_1 = arith.constant 0 : index
    %c0_2 = arith.constant 0 : index
    %1 = vector.load %arg2[%c0_1, %c0_2] : memref<128x256xf32, #tpu.memory_space<vmem>>, vector<128x256xf32>
    %cst = arith.constant dense<0.000000e+00> : vector<8x256xf32>
    %2 = tpu.matmul %0, %1, %cst {dimension_numbers = #tpu.dot_dimension_numbers<[1], [0], [0], [1], [0, 0, 1, 1], [], []>} : vector<8x128xf32>, vector<128x256xf32>, vector<8x256xf32> -> vector<8x256xf32>
    %c0_3 = arith.constant 0 : index
    %c0_4 = arith.constant 0 : index
    %3 = vector.load %arg3[%c0_3, %c0_4] : memref<1x256xf32, #tpu.memory_space<vmem>>, vector<1x256xf32>
    %4 = vector.broadcast %3 : vector<1x256xf32> to vector<8x256xf32>
    %5 = arith.addf %2, %4 : vector<8x256xf32>
    %cst_5 = arith.constant 0.000000e+00 : f32
    %6 = vector.broadcast %cst_5 : f32 to vector<8x256xf32>
    %7 = arith.maximumf %5, %6 : vector<8x256xf32>
    %c0_6 = arith.constant 0 : index
    %c0_7 = arith.constant 0 : index
    %8 = vector.load %arg4[%c0_6, %c0_7] : memref<256x1024xf32, #tpu.memory_space<vmem>>, vector<256x1024xf32>
    %cst_8 = arith.constant dense<0.000000e+00> : vector<8x1024xf32>
    %9 = tpu.matmul %7, %8, %cst_8 {dimension_numbers = #tpu.dot_dimension_numbers<[1], [0], [0], [1], [0, 0, 1, 1], [], []>} : vector<8x256xf32>, vector<256x1024xf32>, vector<8x1024xf32> -> vector<8x1024xf32>
    %c0_9 = arith.constant 0 : index
    %c0_10 = arith.constant 0 : index
    %10 = vector.load %arg5[%c0_9, %c0_10] : memref<1x1024xf32, #tpu.memory_space<vmem>>, vector<1x1024xf32>
    %11 = vector.broadcast %10 : vector<1x1024xf32> to vector<8x1024xf32>
    %12 = arith.addf %9, %11 : vector<8x1024xf32>
    %cst_11 = arith.constant 0.000000e+00 : f32
    %13 = vector.broadcast %cst_11 : f32 to vector<8x1024xf32>
    %14 = arith.maximumf %12, %13 : vector<8x1024xf32>
    %c0_12 = arith.constant 0 : index
    %c0_13 = arith.constant 0 : index
    %15 = vector.load %arg6[%c0_12, %c0_13] : memref<8x1024xf32, #tpu.memory_space<vmem>>, vector<8x1024xf32>
    tpu.vector_store %arg6[%c0_12, %c0_13], %14 {strides = array<i32>} : memref<8x1024xf32, #tpu.memory_space<vmem>>, vector<8x1024xf32>,
    return
  }
  func.func @transform_0(%arg0: i32) -> (i32, i32) {
    %c0_i32 = arith.constant 0 : i32
    %c0_i32_0 = arith.constant 0 : i32
    return %arg0, %c0_i32 : i32, i32
  }
  func.func @transform_1(%arg0: i32) -> (i32, i32) {
    %c0_i32 = arith.constant 0 : i32
    %c0_i32_0 = arith.constant 0 : i32
    %c0_i32_1 = arith.constant 0 : i32
    return %c0_i32, %c0_i32_0 : i32, i32
  }
  func.func @transform_2(%arg0: i32) -> (i32, i32) {
    %c0_i32 = arith.constant 0 : i32
    %c0_i32_0 = arith.constant 0 : i32
    %c0_i32_1 = arith.constant 0 : i32
    return %c0_i32, %c0_i32_0 : i32, i32
  }
  func.func @transform_3(%arg0: i32) -> (i32, i32) {
    %c0_i32 = arith.constant 0 : i32
    %c0_i32_0 = arith.constant 0 : i32
    %c0_i32_1 = arith.constant 0 : i32
    return %c0_i32, %c0_i32_0 : i32, i32
  }
  func.func @transform_4(%arg0: i32) -> (i32, i32) {
    %c0_i32 = arith.constant 0 : i32
    %c0_i32_0 = arith.constant 0 : i32
    %c0_i32_1 = arith.constant 0 : i32
    return %c0_i32, %c0_i32_0 : i32, i32
  }
  func.func @transform_5(%arg0: i32) -> (i32, i32) {
    %c0_i32 = arith.constant 0 : i32
    %c0_i32_0 = arith.constant 0 : i32
    return %arg0, %c0_i32 : i32, i32
  }
}

</mosaic_0001>

<bundles_post_ra>
// kernel: tpu_custom_call.1
= control target key start
LH: loop header
LB: loop body
LE: loop exit
PB: predicated region body
PF: predicated region fallthrough
CT: control target
= control target key end

     0   :  { %10 = vsyncpa [#allocation3], 0  ;;  %s1300_s0 = inlined_call_operand.hbm [shape: f32[8,128], index: 0, kind: input, shape index: {}]   ;;  %s1301_s1 = inlined_call_operand.hbm [shape: f32[128,256], index: 1, kind: input, shape index: {}]   ;;  %s1302_s2 = inlined_call_operand.vmem [shape: f32[1,256], index: 2, kind: input, shape index: {}]   ;;  %s1303_s3 = inlined_call_operand.hbm [shape: f32[256,1024], index: 3, kind: input, shape index: {}]   ;;  %s1304_s4 = inlined_call_operand.vmem [shape: f32[1,1024], index: 4, kind: input, shape index: {}]   ;;  %s1305_s5 = inlined_call_operand.hbm [shape: f32[8,1024], index: 5, kind: output, shape index: {}]  }
   0x1   :  { %11 = vsyncpa [#allocation6], 0 }
   0x2   :  { %12 = vsyncpa [#allocation4], 0  ;;  %s1183_s18 = smov [#allocation5]   ;;  %s1089_s22 = scalar_lea.hbm %s1301_s1, 4096 }
   0x3   :  { %s28_s19 = sshll.u32 %s1183_s18, 4  ;;  %p1090_p0 = scmp.ne.s32.totalorder %s1301_s1, %s1089_s22  ;;  %s29_s19 = int_to_ptr.vmem [resolvable:$true] %s28_s19 }
   0x4   :  { %p1093_p1 = scmp.lt.u32.totalorder %s1089_s22, %s1301_s1 }
   0x6   :  { %p1095_p2 = pnand %p1093_p1, %p1090_p0 }
   0x8   :  { %1098 = shalt.err (!%p1095_p2)
}
   0x9   :  { %s1099_s27 = scalar_lea.vmem %s29_s19, 4096  ;;  %p1104_p4 = scmp.lt.s32.totalorder %s29_s19, %s29_s19 }
   0xa   :  { %p1100_p3 = scmp.ne.s32.totalorder %s29_s19, %s1099_s27  ;;  %p1105_p5 = scmp.lt.s32.totalorder %s1099_s27, %s1099_s27 }
   0xc   :  { %p1106_p6 = por %p1105_p5, %p1104_p4 }
   0xe   :  { %p1107_p7 = pnand %p1106_p6, %p1100_p3 }
  0x10   :  { %1110 = shalt.err (!%p1107_p7)
}
  0x11   :  { %s1184_s28 = smov 256   ;;  %s1185_s29 = smov 16  }
  0x12   :  { %34 = dma.hbm_to_vmem [thread:$0]  %s1301_s1, 4096, %s29_s19, [#allocation6], %s1184_s28, %s1184_s28, %s1185_s29  }
  0x13   :  { %s1186_s7 = smov [#allocation2]   ;;  %s1187_s9 = smov [#allocation7]  }
  0x14   :  { %s19_s8 = sshll.u32 %s1186_s7, 4  ;;  %s42_s10 = sshll.u32 %s1187_s9, 4  ;;  %s20_s8 = int_to_ptr.vmem [resolvable:$true] %s19_s8  ;;  %s43_s10 = int_to_ptr.vmem [resolvable:$true] %s42_s10 }
  0x15   :  { %s1111_s13 = scalar_lea.hbm %s1300_s0, 128 }
  0x16   :  { %p1112_p8 = scmp.ne.s32.totalorder %s1300_s0, %s1111_s13  ;;  %p1115_p9 = scmp.lt.u32.totalorder %s1111_s13, %s1300_s0 }
  0x18   :  { %p1117_p10 = pnand %p1115_p9, %p1112_p8 }
  0x1a   :  { %1120 = shalt.err (!%p1117_p10)
}
  0x1b   :  { %s1121_s1 = scalar_lea.vmem %s20_s8, 128  ;;  %p1126_p12 = scmp.lt.s32.totalorder %s20_s8, %s20_s8 }
  0x1c   :  { %p1122_p11 = scmp.ne.s32.totalorder %s20_s8, %s1121_s1  ;;  %p1127_p13 = scmp.lt.s32.totalorder %s1121_s1, %s1121_s1 }
  0x1e   :  { %p1128_p0 = por %p1127_p13, %p1126_p12 }
  0x20   :  { %p1129_p1 = pnand %p1128_p0, %p1122_p11 }
  0x22   :  { %1132 = shalt.err (!%p1129_p1)
}
  0x23   :  { %22 = dma.hbm_to_vmem [thread:$0]  %s1300_s0, 128, %s20_s8, [#allocation3]  }
  0x24   :  { %s1133_s22 = scalar_lea.hbm %s1303_s3, 32768 }
  0x25   :  { %p1134_p2 = scmp.ne.s32.totalorder %s1303_s3, %s1133_s22  ;;  %p1137_p3 = scmp.lt.u32.totalorder %s1133_s22, %s1303_s3 }
  0x27   :  { %p1139_p4 = pnand %p1137_p3, %p1134_p2 }
  0x29   :  { %1142 = shalt.err (!%p1139_p4)
}
  0x2a   :  { %s1143_s27 = scalar_lea.vmem %s43_s10, 32768  ;;  %p1148_p6 = scmp.lt.s32.totalorder %s43_s10, %s43_s10 }
  0x2b   :  { %p1144_p5 = scmp.ne.s32.totalorder %s43_s10, %s1143_s27  ;;  %p1149_p7 = scmp.lt.s32.totalorder %s1143_s27, %s1143_s27 }
  0x2d   :  { %p1150_p8 = por %p1149_p7, %p1148_p6 }
  0x2f   :  { %p1151_p9 = pnand %p1150_p8, %p1144_p5 }
  0x31   :  { %1154 = shalt.err (!%p1151_p9)
}
  0x32   :  { %s1188_s0 = smov 1024   ;;  %s1189_s28 = smov 64  }
  0x33   :  { %48 = dma.hbm_to_vmem [thread:$0]  %s1303_s3, 32768, %s43_s10, [#allocation6], %s1188_s0, %s1188_s0, %s1189_s28  }
  0x34   :  { %1177 = dma.done.wait [#allocation3], 128  }
  0x35   :  { %1178 = vsyncadd [#allocation3], 4294967168 }
  0x36   :  { %1179 = dma.done.wait [#allocation6], 36864  }
  0x37   :  { %1180 = vsyncadd [#allocation6], 4294930432  ;;  %v1190_v0 = vmov 0.0   ;;  %v62_v1 = vld [vmem:[#allocation5 + $0x8] sm:$0xff]  ;;  %v64_v2 = vld [vmem:[#allocation5 + $0x18] sm:$0xff] }
  0x38   :  { %169 = vmatprep.mubr.f32.mxu0 %v1190_v0  ;;  %v61_v3 = vld [vmem:[#allocation5] sm:$0xff]  ;;  %v792_v4 = vpack.c.bf16 %v64_v2, %v62_v1  ;;  %v63_v5 = vld [vmem:[#allocation5 + $0x10] sm:$0xff]  ;;  %v66_v6 = vld [vmem:[#allocation5 + $0x28] sm:$0xff] }
  0x39   :  { %v68_v7 = vld [vmem:[#allocation5 + $0x38] sm:$0xff]  ;;  %v794_v8 = vpack.c.bf16 %v63_v5, %v61_v3  ;;  %v65_v10 = vld [vmem:[#allocation5 + $0x20] sm:$0xff]  ;;  %v67_v11 = vld [vmem:[#allocation5 + $0x30] sm:$0xff] }
  0x3a   :  { %v796_v9 = vpack.c.bf16 %v68_v7, %v66_v6  ;;  %v70_v12 = vld [vmem:[#allocation5 + $0x48] sm:$0xff]  ;;  %793 = vmatprep.subr.bf16.mxu0 %v792_v4  ;;  %v72_v13 = vld [vmem:[#allocation5 + $0x58] sm:$0xff]  ;;  %v798_v14 = vpack.c.bf16 %v67_v11, %v65_v10  ;;  %v69_v16 = vld [vmem:[#allocation5 + $0x40] sm:$0xff] }
  0x3b   :  { %795 = vmatpush1.bf16.msra.mxu0 %v794_v8  ;;  %v800_v15 = vpack.c.bf16 %v72_v13, %v70_v12  ;;  %v71_v17 = vld [vmem:[#allocation5 + $0x50] sm:$0xff]  ;;  %v74_v18 = vld [vmem:[#allocation5 + $0x68] sm:$0xff]  ;;  %v76_v19 = vld [vmem:[#allocation5 + $0x78] sm:$0xff] }
  0x3c   :  { %797 = vmatprep.subr.bf16.mxu0 %v796_v9  ;;  %v802_v20 = vpack.c.bf16 %v71_v17, %v69_v16  ;;  %v804_v21 = vpack.c.bf16 %v76_v19, %v74_v18  ;;  %v73_v22 = vld [vmem:[#allocation5 + $0x60] sm:$0xff]  ;;  %v75_v23 = vld [vmem:[#allocation5 + $0x70] sm:$0xff]  ;;  %v78_v24 = vld [vmem:[#allocation5 + $0x88] sm:$0xff] }
  0x3d   :  { %v80_v25 = vld [vmem:[#allocation5 + $0x98] sm:$0xff]  ;;  %v179_v26 = vld [vmem:[#allocation7 + $0x8] sm:$0xff]  ;;  %v806_v28 = vpack.c.bf16 %v75_v23, %v73_v22  ;;  %v178_v30 = vld [vmem:[#allocation7] sm:$0xff] }
  0x3e   :  { %v187_v27 = vld [vmem:[#allocation7 + $0x48] sm:$0xff]  ;;  %v186_v31 = vld [vmem:[#allocation7 + $0x40] sm:$0xff]  ;;  %v808_v32 = vpack.c.bf16 %v80_v25, %v78_v24  ;;  %v79_v34 = vld [vmem:[#allocation5 + $0x90] sm:$0xff] }
  0x3f   :  { %799 = vmatpush1.bf16.msra.mxu0 %v798_v14  ;;  %v824_v29 = vpack.c.bf16 %v187_v27, %v179_v26  ;;  %v77_v33 = vld [vmem:[#allocation5 + $0x80] sm:$0xff]  ;;  %v826_v35 = vpack.c.bf16 %v186_v31, %v178_v30  ;;  %v195_v36 = vld [vmem:[#allocation7 + $0x88] sm:$0xff]  ;;  %v84_v38 = vld [vmem:[#allocation5 + $0xb8] sm:$0xff] }
  0x40   :  { %801 = vmatprep.subr.bf16.mxu0 %v800_v15  ;;  %v82_v37 = vld [vmem:[#allocation5 + $0xa8] sm:$0xff]  ;;  %v194_v41 = vld [vmem:[#allocation7 + $0x80] sm:$0xff]  ;;  %v810_v43 = vpack.c.bf16 %v79_v34, %v77_v33  ;;  %v83_v49 = vld [vmem:[#allocation5 + $0xb0] sm:$0xff] }
  0x41   :  { %825 = vmatprep.subr.bf16.mxu1 %v824_v29  ;;  %v203_v39 = vld [vmem:[#allocation7 + $0xc8] sm:$0xff]  ;;  %v202_v42 = vld [vmem:[#allocation7 + $0xc0] sm:$0xff]  ;;  %v812_v47 = vpack.c.bf16 %v84_v38, %v82_v37  ;;  %v88_v53 = vld [vmem:[#allocation5 + $0xd8] sm:$0xff] }
  0x42   :  { %827 = vmatpush1.bf16.msra.mxu1 %v826_v35  ;;  %v828_v40 = vpack.c.bf16 %v203_v39, %v195_v36  ;;  %v830_v44 = vpack.c.bf16 %v202_v42, %v194_v41  ;;  %v211_v45 = vld [vmem:[#allocation7 + $0x108] sm:$0xff]  ;;  %v81_v48 = vld [vmem:[#allocation5 + $0xa0] sm:$0xff]  ;;  %v87_v0 = vld [vmem:[#allocation5 + $0xd0] sm:$0xff] }
  0x43   :  { %803 = vmatpush1.bf16.msra.mxu0 %v802_v20  ;;  %v219_v46 = vld [vmem:[#allocation7 + $0x148] sm:$0xff]  ;;  %v210_v51 = vld [vmem:[#allocation7 + $0x100] sm:$0xff]  ;;  %v814_v58 = vpack.c.bf16 %v83_v49, %v81_v48  ;;  %v92_v3 = vld [vmem:[#allocation5 + $0xf8] sm:$0xff] }
  0x44   :  { %805 = vmatprep.subr.bf16.mxu0 %v804_v21  ;;  %829 = vmatprep.subr.bf16.mxu1 %v828_v40  ;;  %v832_v50 = vpack.c.bf16 %v219_v46, %v211_v45  ;;  %v86_v52 = vld [vmem:[#allocation5 + $0xc8] sm:$0xff]  ;;  %v218_v54 = vld [vmem:[#allocation7 + $0x140] sm:$0xff]  ;;  %v91_v12 = vld [vmem:[#allocation5 + $0xf0] sm:$0xff] }
  0x45   :  { %v834_v55 = vpack.c.bf16 %v218_v54, %v210_v51  ;;  %v227_v56 = vld [vmem:[#allocation7 + $0x188] sm:$0xff]  ;;  %v226_v60 = vld [vmem:[#allocation7 + $0x180] sm:$0xff]  ;;  %v816_v62 = vpack.c.bf16 %v88_v53, %v86_v52  ;;  %v181_v15 = vld [vmem:[#allocation7 + $0x18] sm:$0xff] }
  0x46   :  { %831 = vmatpush1.bf16.msra.mxu1 %v830_v44  ;;  %v235_v57 = vld [vmem:[#allocation7 + $0x1c8] sm:$0xff]  ;;  %v234_v61 = vld [vmem:[#allocation7 + $0x1c0] sm:$0xff]  ;;  %v189_v16 = vld [vmem:[#allocation7 + $0x58] sm:$0xff] }
  0x47   :  { %807 = vmatpush1.bf16.msra.mxu0 %v806_v28  ;;  %833 = vmatprep.subr.bf16.mxu1 %v832_v50  ;;  %v836_v59 = vpack.c.bf16 %v235_v57, %v227_v56  ;;  %v85_v63 = vld [vmem:[#allocation5 + $0xc0] sm:$0xff]  ;;  %v243_v1 = vld [vmem:[#allocation7 + $0x208] sm:$0xff]  ;;  %v838_v5 = vpack.c.bf16 %v234_v61, %v226_v60  ;;  %v180_v19 = vld [vmem:[#allocation7 + $0x10] sm:$0xff]  ;;  %v888_v23 = vpack.c.bf16 %v189_v16, %v181_v15 }
  0x48   :  { %809 = vmatprep.subr.bf16.mxu0 %v808_v32  ;;  %v90_v2 = vld [vmem:[#allocation5 + $0xe8] sm:$0xff]  ;;  %v818_v6 = vpack.c.bf16 %v87_v0, %v85_v63  ;;  %v89_v7 = vld [vmem:[#allocation5 + $0xe0] sm:$0xff]  ;;  %v188_v24 = vld [vmem:[#allocation7 + $0x50] sm:$0xff] }
  0x49   :  { %v251_v4 = vld [vmem:[#allocation7 + $0x248] sm:$0xff]  ;;  %v242_v9 = vld [vmem:[#allocation7 + $0x200] sm:$0xff]  ;;  %v820_v11 = vpack.c.bf16 %v92_v3, %v90_v2  ;;  %v822_v18 = vpack.c.bf16 %v91_v12, %v89_v7  ;;  %v197_v27 = vld [vmem:[#allocation7 + $0x98] sm:$0xff]  ;;  %v890_v31 = vpack.c.bf16 %v188_v24, %v180_v19 }
  0x4a   :  { %835 = vmatpush1.bf16.msra.mxu1 %v834_v55  ;;  %v840_v8 = vpack.c.bf16 %v251_v4, %v243_v1  ;;  %v250_v10 = vld [vmem:[#allocation7 + $0x240] sm:$0xff]  ;;  %v259_v13 = vld [vmem:[#allocation7 + $0x288] sm:$0xff]  ;;  %v205_v28 = vld [vmem:[#allocation7 + $0xd8] sm:$0xff] }
  0x4b   :  { %811 = vmatpush1.bf16.msra.mxu0 %v810_v43  ;;  %837 = vmatprep.subr.bf16.mxu1 %v836_v59  ;;  %v267_v14 = vld [vmem:[#allocation7 + $0x2c8] sm:$0xff]  ;;  %v842_v17 = vpack.c.bf16 %v250_v10, %v242_v9  ;;  %v258_v21 = vld [vmem:[#allocation7 + $0x280] sm:$0xff]  ;;  %v60_v29 = vld [vmem:[#allocation2] sm:$0xff]  ;;  %v892_v36 = vpack.c.bf16 %v205_v28, %v197_v27 }
  0x4c   :  { %813 = vmatprep.subr.bf16.mxu0 %v812_v47  ;;  %v844_v20 = vpack.c.bf16 %v267_v14, %v259_v13  ;;  %v266_v22 = vld [vmem:[#allocation7 + $0x2c0] sm:$0xff]  ;;  %v275_v25 = vld [vmem:[#allocation7 + $0x308] sm:$0xff]  ;;  %v196_v32 = vld [vmem:[#allocation7 + $0x90] sm:$0xff] }
  0x4d   :  { %v283_v26 = vld [vmem:[#allocation7 + $0x348] sm:$0xff]  ;;  %v846_v30 = vpack.c.bf16 %v266_v22, %v258_v21  ;;  %v274_v34 = vld [vmem:[#allocation7 + $0x300] sm:$0xff]  ;;  %v204_v37 = vld [vmem:[#allocation7 + $0xd0] sm:$0xff] }
  0x4e   :  { %839 = vmatpush1.bf16.msra.mxu1 %v838_v5  ;;  %v848_v33 = vpack.c.bf16 %v283_v26, %v275_v25  ;;  %v282_v35 = vld [vmem:[#allocation7 + $0x340] sm:$0xff]  ;;  %v291_v38 = vld [vmem:[#allocation7 + $0x388] sm:$0xff]  ;;  %v213_v40 = vld [vmem:[#allocation7 + $0x118] sm:$0xff]  ;;  %v894_v43 = vpack.c.bf16 %v204_v37, %v196_v32 }
  0x4f   :  { %815 = vmatpush1.bf16.msra.mxu0 %v814_v58  ;;  %841 = vmatprep.subr.bf16.mxu1 %v840_v8  ;;  %v299_v39 = vld [vmem:[#allocation7 + $0x3c8] sm:$0xff]  ;;  %v221_v41 = vld [vmem:[#allocation7 + $0x158] sm:$0xff]  ;;  %v850_v42 = vpack.c.bf16 %v282_v35, %v274_v34  ;;  %v212_v44 = vld [vmem:[#allocation7 + $0x110] sm:$0xff] }
  0x50   :  { %817 = vmatprep.subr.bf16.mxu0 %v816_v62  ;;  %v852_v45 = vpack.c.bf16 %v299_v39, %v291_v38  ;;  %v290_v46 = vld [vmem:[#allocation7 + $0x380] sm:$0xff]  ;;  %v896_v48 = vpack.c.bf16 %v221_v41, %v213_v40  ;;  %v220_v49 = vld [vmem:[#allocation7 + $0x150] sm:$0xff]  ;;  %v307_v50 = vld [vmem:[#allocation7 + $0x408] sm:$0xff] }
  0x51   :  { %v298_v47 = vld [vmem:[#allocation7 + $0x3c0] sm:$0xff]  ;;  %v315_v51 = vld [vmem:[#allocation7 + $0x448] sm:$0xff]  ;;  %v229_v52 = vld [vmem:[#allocation7 + $0x198] sm:$0xff]  ;;  %v898_v55 = vpack.c.bf16 %v220_v49, %v212_v44 }
  0x52   :  { %843 = vmatpush1.bf16.msra.mxu1 %v842_v17  ;;  %v237_v53 = vld [vmem:[#allocation7 + $0x1d8] sm:$0xff]  ;;  %v854_v54 = vpack.c.bf16 %v298_v47, %v290_v46  ;;  %v228_v56 = vld [vmem:[#allocation7 + $0x190] sm:$0xff]  ;;  %v856_v57 = vpack.c.bf16 %v315_v51, %v307_v50  ;;  %v306_v58 = vld [vmem:[#allocation7 + $0x400] sm:$0xff] }
  0x53   :  { %819 = vmatpush1.bf16.msra.mxu0 %v818_v6  ;;  %845 = vmatprep.subr.bf16.mxu1 %v844_v20  ;;  %v314_v59 = vld [vmem:[#allocation7 + $0x440] sm:$0xff]  ;;  %v900_v60 = vpack.c.bf16 %v237_v53, %v229_v52  ;;  %v236_v61 = vld [vmem:[#allocation7 + $0x1d0] sm:$0xff]  ;;  %v323_v62 = vld [vmem:[#allocation7 + $0x488] sm:$0xff] }
  0x54   :  { %821 = vmatprep.subr.bf16.mxu0 %v820_v11  ;;  %v331_v63 = vld [vmem:[#allocation7 + $0x4c8] sm:$0xff]  ;;  %v245_v0 = vld [vmem:[#allocation7 + $0x218] sm:$0xff]  ;;  %v858_v2 = vpack.c.bf16 %v314_v59, %v306_v58  ;;  %v902_v3 = vpack.c.bf16 %v236_v61, %v228_v56  ;;  %v244_v4 = vld [vmem:[#allocation7 + $0x210] sm:$0xff] }
  0x55   :  { %v253_v1 = vld [vmem:[#allocation7 + $0x258] sm:$0xff]  ;;  %v860_v5 = vpack.c.bf16 %v331_v63, %v323_v62  ;;  %v322_v6 = vld [vmem:[#allocation7 + $0x480] sm:$0xff]  ;;  %v252_v9 = vld [vmem:[#allocation7 + $0x250] sm:$0xff] }
  0x56   :  { %847 = vmatpush1.bf16.msra.mxu1 %v846_v30  ;;  %v330_v7 = vld [vmem:[#allocation7 + $0x4c0] sm:$0xff]  ;;  %v904_v8 = vpack.c.bf16 %v253_v1, %v245_v0  ;;  %v339_v10 = vld [vmem:[#allocation7 + $0x508] sm:$0xff]  ;;  %v261_v12 = vld [vmem:[#allocation7 + $0x298] sm:$0xff]  ;;  %v906_v15 = vpack.c.bf16 %v252_v9, %v244_v4 }
  0x57   :  { %823 = vmatpush1.bf16.msra.mxu0 %v822_v18  ;;  %849 = vmatprep.subr.bf16.mxu1 %v848_v33  ;;  %v347_v11 = vld [vmem:[#allocation7 + $0x548] sm:$0xff]  ;;  %v269_v13 = vld [vmem:[#allocation7 + $0x2d8] sm:$0xff]  ;;  %v862_v14 = vpack.c.bf16 %v330_v7, %v322_v6  ;;  %v260_v16 = vld [vmem:[#allocation7 + $0x290] sm:$0xff] }
  0x58   :  { %889 = vmatprep.subr.bf16.mxu0 %v888_v23  ;;  %v864_v17 = vpack.c.bf16 %v347_v11, %v339_v10  ;;  %v338_v18 = vld [vmem:[#allocation7 + $0x500] sm:$0xff]  ;;  %v908_v20 = vpack.c.bf16 %v269_v13, %v261_v12  ;;  %v268_v21 = vld [vmem:[#allocation7 + $0x2d0] sm:$0xff]  ;;  %v355_v22 = vld [vmem:[#allocation7 + $0x588] sm:$0xff] }
  0x59   :  { %v346_v19 = vld [vmem:[#allocation7 + $0x540] sm:$0xff]  ;;  %v363_v23 = vld [vmem:[#allocation7 + $0x5c8] sm:$0xff]  ;;  %v277_v24 = vld [vmem:[#allocation7 + $0x318] sm:$0xff]  ;;  %v910_v27 = vpack.c.bf16 %v268_v21, %v260_v16 }
  0x5a   :  { %170 = vmatmul.mubr.f32.vlgmr.msra.gmra.mrb[0].mxu0 %v60_v29  ;;  %851 = vmatpush1.bf16.msra.mxu1 %v850_v42  ;;  %v285_v25 = vld [vmem:[#allocation7 + $0x358] sm:$0xff]  ;;  %v866_v26 = vpack.c.bf16 %v346_v19, %v338_v18  ;;  %v276_v28 = vld [vmem:[#allocation7 + $0x310] sm:$0xff]  ;;  %v868_v29 = vpack.c.bf16 %v363_v23, %v355_v22  ;;  %v354_v30 = vld [vmem:[#allocation7 + $0x580] sm:$0xff] }
  0x5b   :  { %891 = vmatpush1.bf16.msra.mxu0 %v890_v31  ;;  %853 = vmatprep.subr.bf16.mxu1 %v852_v45  ;;  %v362_v31 = vld [vmem:[#allocation7 + $0x5c0] sm:$0xff]  ;;  %v912_v32 = vpack.c.bf16 %v285_v25, %v277_v24  ;;  %v284_v33 = vld [vmem:[#allocation7 + $0x350] sm:$0xff]  ;;  %v371_v34 = vld [vmem:[#allocation7 + $0x608] sm:$0xff] }
  0x5c   :  { %893 = vmatprep.subr.bf16.mxu0 %v892_v36  ;;  %v379_v35 = vld [vmem:[#allocation7 + $0x648] sm:$0xff]  ;;  %v293_v36 = vld [vmem:[#allocation7 + $0x398] sm:$0xff]  ;;  %v870_v38 = vpack.c.bf16 %v362_v31, %v354_v30  ;;  %v914_v39 = vpack.c.bf16 %v284_v33, %v276_v28  ;;  %v292_v40 = vld [vmem:[#allocation7 + $0x390] sm:$0xff] }
  0x5d   :  { %v301_v37 = vld [vmem:[#allocation7 + $0x3d8] sm:$0xff]  ;;  %v872_v41 = vpack.c.bf16 %v379_v35, %v371_v34  ;;  %v370_v42 = vld [vmem:[#allocation7 + $0x600] sm:$0xff]  ;;  %v300_v45 = vld [vmem:[#allocation7 + $0x3d0] sm:$0xff] }
  0x5e   :  { %855 = vmatpush1.bf16.msra.mxu1 %v854_v54  ;;  %v916_v44 = vpack.c.bf16 %v301_v37, %v293_v36  ;;  %v387_v46 = vld [vmem:[#allocation7 + $0x688] sm:$0xff]  ;;  %v317_v49 = vld [vmem:[#allocation7 + $0x458] sm:$0xff]  ;;  %v918_v51 = vpack.c.bf16 %v300_v45, %v292_v40  ;;  %v308_v52 = vld [vmem:[#allocation7 + $0x410] sm:$0xff] }
  0x5f   :  { %895 = vmatpush1.bf16.msra.mxu0 %v894_v43  ;;  %857 = vmatprep.subr.bf16.mxu1 %v856_v57  ;;  %v378_v43 = vld [vmem:[#allocation7 + $0x640] sm:$0xff]  ;;  %v395_v47 = vld [vmem:[#allocation7 + $0x6c8] sm:$0xff]  ;;  %v316_v57 = vld [vmem:[#allocation7 + $0x450] sm:$0xff] }
  0x60   :  { %897 = vmatprep.subr.bf16.mxu0 %v896_v48  ;;  %v309_v48 = vld [vmem:[#allocation7 + $0x418] sm:$0xff]  ;;  %v874_v50 = vpack.c.bf16 %v378_v43, %v370_v42  ;;  %v876_v53 = vpack.c.bf16 %v395_v47, %v387_v46  ;;  %v386_v54 = vld [vmem:[#allocation7 + $0x680] sm:$0xff]  ;;  %v403_v58 = vld [vmem:[#allocation7 + $0x708] sm:$0xff]  ;;  %v922_v63 = vpack.c.bf16 %v316_v57, %v308_v52 }
  0x61   :  { %v920_v56 = vpack.c.bf16 %v317_v49, %v309_v48  ;;  %v411_v59 = vld [vmem:[#allocation7 + $0x748] sm:$0xff]  ;;  %v333_v61 = vld [vmem:[#allocation7 + $0x4d8] sm:$0xff]  ;;  %v402_v1 = vld [vmem:[#allocation7 + $0x700] sm:$0xff] }
  0x62   :  { %859 = vmatpush1.bf16.msra.mxu1 %v858_v2  ;;  %v880_v0 = vpack.c.bf16 %v411_v59, %v403_v58  ;;  %v410_v2 = vld [vmem:[#allocation7 + $0x740] sm:$0xff]  ;;  %v324_v4 = vld [vmem:[#allocation7 + $0x490] sm:$0xff]  ;;  %v341_v6 = vld [vmem:[#allocation7 + $0x518] sm:$0xff] }
  0x63   :  { %899 = vmatpush1.bf16.msra.mxu0 %v898_v55  ;;  %861 = vmatprep.subr.bf16.mxu1 %v860_v5  ;;  %v394_v55 = vld [vmem:[#allocation7 + $0x6c0] sm:$0xff]  ;;  %v332_v5 = vld [vmem:[#allocation7 + $0x4d0] sm:$0xff]  ;;  %v349_v7 = vld [vmem:[#allocation7 + $0x558] sm:$0xff] }
  0x64   :  { %901 = vmatprep.subr.bf16.mxu0 %v900_v60  ;;  %v325_v60 = vld [vmem:[#allocation7 + $0x498] sm:$0xff]  ;;  %v878_v62 = vpack.c.bf16 %v394_v55, %v386_v54  ;;  %v926_v9 = vpack.c.bf16 %v332_v5, %v324_v4  ;;  %v928_v10 = vpack.c.bf16 %v349_v7, %v341_v6  ;;  %v340_v11 = vld [vmem:[#allocation7 + $0x510] sm:$0xff]  ;;  %v418_v43 = vld [vmem:[#allocation7 + $0x780] sm:$0xff] }
  0x65   :  { %v348_v12 = vld [vmem:[#allocation7 + $0x550] sm:$0xff]  ;;  %v357_v13 = vld [vmem:[#allocation7 + $0x598] sm:$0xff]  ;;  %v199_v7 = vld [vmem:[#allocation7 + $0xa8] sm:$0xff] }
  0x66   :  { %863 = vmatpush1.bf16.msra.mxu1 %v862_v14  ;;  %v365_v14 = vld [vmem:[#allocation7 + $0x5d8] sm:$0xff]  ;;  %v364_v18 = vld [vmem:[#allocation7 + $0x5d0] sm:$0xff] }
  0x67   :  { %903 = vmatpush1.bf16.msra.mxu0 %v902_v3  ;;  %865 = vmatprep.subr.bf16.mxu1 %v864_v17  ;;  %v924_v3 = vpack.c.bf16 %v333_v61, %v325_v60  ;;  %v932_v16 = vpack.c.bf16 %v365_v14, %v357_v13  ;;  %v356_v17 = vld [vmem:[#allocation7 + $0x590] sm:$0xff]  ;;  %v373_v19 = vld [vmem:[#allocation7 + $0x618] sm:$0xff]  ;;  %v198_v14 = vld [vmem:[#allocation7 + $0xa0] sm:$0xff] }
  0x68   :  { %905 = vmatprep.subr.bf16.mxu0 %v904_v8  ;;  %v882_v8 = vpack.c.bf16 %v410_v2, %v402_v1  ;;  %v934_v21 = vpack.c.bf16 %v364_v18, %v356_v17  ;;  %v372_v23 = vld [vmem:[#allocation7 + $0x610] sm:$0xff]  ;;  %v389_v25 = vld [vmem:[#allocation7 + $0x698] sm:$0xff] }
  0x69   :  { %v380_v24 = vld [vmem:[#allocation7 + $0x650] sm:$0xff]  ;;  %v405_v31 = vld [vmem:[#allocation7 + $0x718] sm:$0xff] }
  0x6a   :  { %867 = vmatpush1.bf16.msra.mxu1 %v866_v26  ;;  %v397_v26 = vld [vmem:[#allocation7 + $0x6d8] sm:$0xff]  ;;  %v396_v30 = vld [vmem:[#allocation7 + $0x6d0] sm:$0xff] }
  0x6b   :  { %907 = vmatpush1.bf16.msra.mxu0 %v906_v15  ;;  %869 = vmatprep.subr.bf16.mxu1 %v868_v29  ;;  %v930_v15 = vpack.c.bf16 %v348_v12, %v340_v11  ;;  %v940_v28 = vpack.c.bf16 %v397_v26, %v389_v25  ;;  %v388_v29 = vld [vmem:[#allocation7 + $0x690] sm:$0xff]  ;;  %v421_v40 = vld [vmem:[#allocation7 + $0x798] sm:$0xff] }
  0x6c   :  { %909 = vmatprep.subr.bf16.mxu0 %v908_v20  ;;  %v381_v20 = vld [vmem:[#allocation7 + $0x658] sm:$0xff]  ;;  %v942_v33 = vpack.c.bf16 %v396_v30, %v388_v29  ;;  %v404_v35 = vld [vmem:[#allocation7 + $0x710] sm:$0xff] }
  0x6d   :  { %v936_v22 = vpack.c.bf16 %v381_v20, %v373_v19  ;;  %v412_v36 = vld [vmem:[#allocation7 + $0x750] sm:$0xff]  ;;  %v429_v42 = vld [vmem:[#allocation7 + $0x7d8] sm:$0xff]  ;;  %v215_v19 = vld [vmem:[#allocation7 + $0x128] sm:$0xff] }
  0x6e   :  { %871 = vmatpush1.bf16.msra.mxu1 %v870_v38  ;;  %v946_v37 = vpack.c.bf16 %v412_v36, %v404_v35  ;;  %v419_v38 = vld [vmem:[#allocation7 + $0x788] sm:$0xff]  ;;  %v948_v45 = vpack.c.bf16 %v429_v42, %v421_v40  ;;  %v420_v47 = vld [vmem:[#allocation7 + $0x790] sm:$0xff]  ;;  %v185_v52 = vld [vmem:[#allocation7 + $0x38] sm:$0xff] }
  0x6f   :  { %911 = vmatpush1.bf16.msra.mxu0 %v910_v27  ;;  %873 = vmatprep.subr.bf16.mxu1 %v872_v41  ;;  %v938_v27 = vpack.c.bf16 %v380_v24, %v372_v23  ;;  %v428_v48 = vld [vmem:[#allocation7 + $0x7d0] sm:$0xff]  ;;  %v193_v54 = vld [vmem:[#allocation7 + $0x78] sm:$0xff]  ;;  %v238_v40 = vld [vmem:[#allocation7 + $0x1e0] sm:$0xff] }
  0x70   :  { %913 = vmatprep.subr.bf16.mxu0 %v912_v32  ;;  %v413_v32 = vld [vmem:[#allocation7 + $0x758] sm:$0xff]  ;;  %v950_v49 = vpack.c.bf16 %v428_v48, %v420_v47  ;;  %v1016_v55 = vpack.c.bf16 %v193_v54, %v185_v52  ;;  %v184_v4 = vld [vmem:[#allocation7 + $0x30] sm:$0xff]  ;;  %v254_v52 = vld [vmem:[#allocation7 + $0x260] sm:$0xff] }
  0x71   :  { %v944_v34 = vpack.c.bf16 %v413_v32, %v405_v31  ;;  %v93_v59 = vld [vmem:[%s1302_s2] sm:$0x3]  ;;  %v192_v5 = vld [vmem:[#allocation7 + $0x70] sm:$0xff] }
  0x72   :  { %875 = vmatpush1.bf16.msra.mxu1 %v874_v50  ;;  %v183_v50 = vld [vmem:[#allocation7 + $0x28] sm:$0xff]  ;;  %v1018_v13 = vpack.c.bf16 %v192_v5, %v184_v4  ;;  %v200_v17 = vld [vmem:[#allocation7 + $0xb0] sm:$0xff]  ;;  %v217_v23 = vld [vmem:[#allocation7 + $0x138] sm:$0xff] }
  0x73   :  { %915 = vmatpush1.bf16.msra.mxu0 %v914_v39  ;;  %877 = vmatprep.subr.bf16.mxu1 %v876_v53  ;;  %v427_v39 = vld [vmem:[#allocation7 + $0x7c8] sm:$0xff]  ;;  %v208_v18 = vld [vmem:[#allocation7 + $0xf0] sm:$0xff]  ;;  %v225_v24 = vld [vmem:[#allocation7 + $0x178] sm:$0xff] }
  0x74   :  { %917 = vmatprep.subr.bf16.mxu0 %v916_v44  ;;  %v884_v41 = vpack.c.bf16 %v427_v39, %v419_v38  ;;  %v426_v44 = vld [vmem:[#allocation7 + $0x7c0] sm:$0xff]  ;;  %v1022_v26 = vpack.c.bf16 %v208_v18, %v200_v17  ;;  %v1024_v30 = vpack.c.bf16 %v225_v24, %v217_v23  ;;  %v216_v31 = vld [vmem:[#allocation7 + $0x130] sm:$0xff]  ;;  %v233_v35 = vld [vmem:[#allocation7 + $0x1b8] sm:$0xff] }
  0x75   :  { %v886_v46 = vpack.c.bf16 %v426_v44, %v418_v43  ;;  %v224_v32 = vld [vmem:[#allocation7 + $0x170] sm:$0xff]  ;;  %v241_v36 = vld [vmem:[#allocation7 + $0x1f8] sm:$0xff]  ;;  %v230_v39 = vld [vmem:[#allocation7 + $0x1a0] sm:$0xff] }
  0x76   :  { %879 = vmatpush1.bf16.msra.mxu1 %v878_v62  ;;  %v1026_v38 = vpack.c.bf16 %v224_v32, %v216_v31  ;;  %v1028_v42 = vpack.c.bf16 %v241_v36, %v233_v35  ;;  %v232_v43 = vld [vmem:[#allocation7 + $0x1b0] sm:$0xff]  ;;  %v249_v47 = vld [vmem:[#allocation7 + $0x238] sm:$0xff] }
  0x77   :  { %919 = vmatpush1.bf16.msra.mxu0 %v918_v51  ;;  %881 = vmatprep.subr.bf16.mxu1 %v880_v0  ;;  %v191_v51 = vld [vmem:[#allocation7 + $0x68] sm:$0xff]  ;;  %v182_v0 = vld [vmem:[#allocation7 + $0x20] sm:$0xff]  ;;  %v240_v44 = vld [vmem:[#allocation7 + $0x1f0] sm:$0xff] }
  0x78   :  { %921 = vmatprep.subr.bf16.mxu0 %v920_v56  ;;  %v952_v53 = vpack.c.bf16 %v191_v51, %v183_v50  ;;  %v95_v56 = vlaneseq  ;;  %v257_v48 = vld [vmem:[#allocation7 + $0x278] sm:$0xff]  ;;  %v1030_v50 = vpack.c.bf16 %v240_v44, %v232_v43  ;;  %v246_v51 = vld [vmem:[#allocation7 + $0x220] sm:$0xff]  ;;  %v296_v31 = vld [vmem:[#allocation7 + $0x3b0] sm:$0xff] }
  0x79   :  { %v1032_v54 = vpack.c.bf16 %v257_v48, %v249_v47  ;;  %v297_v23 = vld [vmem:[#allocation7 + $0x3b8] sm:$0xff]  ;;  %v304_v32 = vld [vmem:[#allocation7 + $0x3f0] sm:$0xff] }
  0x7a   :  { %883 = vmatpush1.bf16.msra.mxu1 %v882_v8  ;;  %v1258_v57 = vshrl.u32 %v95_v56, 7  ;;  %v207_v8 = vld [vmem:[#allocation7 + $0xe8] sm:$0xff]  ;;  %v256_v56 = vld [vmem:[#allocation7 + $0x270] sm:$0xff]  ;;  %v305_v24 = vld [vmem:[#allocation7 + $0x3f8] sm:$0xff] }
  0x7b   :  { %923 = vmatpush1.bf16.msra.mxu0 %v922_v63  ;;  %885 = vmatprep.subr.bf16.mxu1 %v884_v41  ;;  %v956_v20 = vpack.c.bf16 %v207_v8, %v199_v7  ;;  %v272_v7 = vld [vmem:[#allocation7 + $0x2f0] sm:$0xff]  ;;  %v279_v8 = vld [vmem:[#allocation7 + $0x328] sm:$0xff]  ;;  %v313_v35 = vld [vmem:[#allocation7 + $0x438] sm:$0xff] }
  0x7c   :  { %925 = vmatprep.subr.bf16.mxu0 %v924_v3  ;;  %v97_v58 = vsub.s32 0, %v1258_v57  ;;  %v101_v60 = vsub.s32 1, %v1258_v57  ;;  %v190_v3 = vld [vmem:[#allocation7 + $0x60] sm:$0xff]  ;;  %v321_v36 = vld [vmem:[#allocation7 + $0x478] sm:$0xff]  ;;  %v312_v43 = vld [vmem:[#allocation7 + $0x430] sm:$0xff] }
  0x7d   :  { %v954_v12 = vpack.c.bf16 %v190_v3, %v182_v0  ;;  %v970_v0 = vpack.c.bf16 %v254_v52, %v246_v51  ;;  %v270_v3 = vld [vmem:[#allocation7 + $0x2e0] sm:$0xff]  ;;  %v320_v44 = vld [vmem:[#allocation7 + $0x470] sm:$0xff]  ;;  %v329_v47 = vld [vmem:[#allocation7 + $0x4b8] sm:$0xff] }
  0x7e   :  { %887 = vmatpush1.bf16.msra.mxu1 %v886_v46  ;;  %v98_v61 = vrot.slane %v93_v59, %v97_v58  ;;  %v102_v62 = vrot.slane %v93_v59, %v101_v60  ;;  %v255_v46 = vld [vmem:[#allocation7 + $0x268] sm:$0xff]  ;;  %v337_v48 = vld [vmem:[#allocation7 + $0x4f8] sm:$0xff]  ;;  %v326_v51 = vld [vmem:[#allocation7 + $0x4a0] sm:$0xff] }
  0x7f   :  { %927 = vmatpush1.bf16.msra.mxu0 %v926_v9  ;;  %953 = vmatprep.subr.bf16.mxu1 %v952_v53  ;;  %v201_v9 = vld [vmem:[#allocation7 + $0xb8] sm:$0xff]  ;;  %v263_v59 = vld [vmem:[#allocation7 + $0x2a8] sm:$0xff]  ;;  %v334_v52 = vld [vmem:[#allocation7 + $0x4e0] sm:$0xff] }
  0x80   :  { %929 = vmatprep.subr.bf16.mxu0 %v928_v10  ;;  %v209_v10 = vld [vmem:[#allocation7 + $0xf8] sm:$0xff] }
  0x83   :  { %931 = vmatpush1.bf16.msra.mxu0 %v930_v15  ;;  %v206_v15 = vld [vmem:[#allocation7 + $0xe0] sm:$0xff] }
  0x84   :  { %933 = vmatprep.subr.bf16.mxu0 %v932_v16  ;;  %v958_v25 = vpack.c.bf16 %v206_v15, %v198_v14  ;;  %v278_v14 = vld [vmem:[#allocation7 + $0x320] sm:$0xff] }
  0x85   :  { %v286_v15 = vld [vmem:[#allocation7 + $0x360] sm:$0xff] }
  0x87   :  { %935 = vmatpush1.bf16.msra.mxu0 %v934_v21  ;;  %v1020_v21 = vpack.c.bf16 %v209_v10, %v201_v9  ;;  %v287_v9 = vld [vmem:[#allocation7 + $0x368] sm:$0xff]  ;;  %v281_v10 = vld [vmem:[#allocation7 + $0x338] sm:$0xff] }
  0x88   :  { %937 = vmatprep.subr.bf16.mxu0 %v936_v22  ;;  %v223_v22 = vld [vmem:[#allocation7 + $0x168] sm:$0xff]  ;;  %v976_v17 = vpack.c.bf16 %v287_v9, %v279_v8 }
  0x89   :  { %v960_v29 = vpack.c.bf16 %v223_v22, %v215_v19  ;;  %v280_v19 = vld [vmem:[#allocation7 + $0x330] sm:$0xff]  ;;  %v303_v22 = vld [vmem:[#allocation7 + $0x3e8] sm:$0xff] }
  0x8a   :  { %v359_v8 = vld [vmem:[#allocation7 + $0x5a8] sm:$0xff] }
  0x8b   :  { %939 = vmatpush1.bf16.msra.mxu0 %v938_v27  ;;  %v214_v27 = vld [vmem:[#allocation7 + $0x120] sm:$0xff]  ;;  %v367_v9 = vld [vmem:[#allocation7 + $0x5e8] sm:$0xff] }
  0x8c   :  { %941 = vmatprep.subr.bf16.mxu0 %v940_v28  ;;  %v222_v28 = vld [vmem:[#allocation7 + $0x160] sm:$0xff] }
  0x8f   :  { %943 = vmatpush1.bf16.msra.mxu0 %v942_v33  ;;  %v231_v33 = vld [vmem:[#allocation7 + $0x1a8] sm:$0xff] }
  0x90   :  { %945 = vmatprep.subr.bf16.mxu0 %v944_v34  ;;  %v239_v34 = vld [vmem:[#allocation7 + $0x1e8] sm:$0xff] }
  0x91   :  { %v964_v41 = vpack.c.bf16 %v239_v34, %v231_v33  ;;  %v311_v33 = vld [vmem:[#allocation7 + $0x428] sm:$0xff] }
  0x92   :  { %v319_v34 = vld [vmem:[#allocation7 + $0x468] sm:$0xff] }
  0x93   :  { %947 = vmatpush1.bf16.msra.mxu0 %v946_v37  ;;  %v962_v37 = vpack.c.bf16 %v222_v28, %v214_v27  ;;  %v294_v27 = vld [vmem:[#allocation7 + $0x3a0] sm:$0xff] }
  0x94   :  { %949 = vmatprep.subr.bf16.mxu0 %v948_v45  ;;  %v247_v45 = vld [vmem:[#allocation7 + $0x228] sm:$0xff]  ;;  %v302_v28 = vld [vmem:[#allocation7 + $0x3e0] sm:$0xff] }
  0x95   :  { %v968_v53 = vpack.c.bf16 %v255_v46, %v247_v45  ;;  %v327_v45 = vld [vmem:[#allocation7 + $0x4a8] sm:$0xff] }
  0x96   :  { %v335_v46 = vld [vmem:[#allocation7 + $0x4e8] sm:$0xff] }
  0x97   :  { %951 = vmatpush1.bf16.msra.mxu0 %v950_v49  ;;  %v966_v49 = vpack.c.bf16 %v238_v40, %v230_v39  ;;  %v310_v39 = vld [vmem:[#allocation7 + $0x420] sm:$0xff] }
  0x98   :  { %1017 = vmatprep.subr.bf16.mxu0 %v1016_v55  ;;  %v248_v55 = vld [vmem:[#allocation7 + $0x230] sm:$0xff]  ;;  %v318_v40 = vld [vmem:[#allocation7 + $0x460] sm:$0xff] }
 0x12d   :  { %v171_v63 = vpop.f32.mrb[0].mxu0 }
 0x12e   :  { %v172_v1 = vadd.f32 %v171_v63, %v98_v61  ;;  %v173_v2 = vpop.f32.mrb[1].mxu0  ;;  %v271_v61 = vld [vmem:[#allocation7 + $0x2e8] sm:$0xff]  ;;  %v273_v63 = vld [vmem:[#allocation7 + $0x2f8] sm:$0xff] }
 0x12f   :  { %v174_v6 = vadd.f32 %v173_v2, %v102_v62  ;;  %v265_v62 = vld [vmem:[#allocation7 + $0x2b8] sm:$0xff]  ;;  %v262_v2 = vld [vmem:[#allocation7 + $0x2a0] sm:$0xff]  ;;  %v972_v4 = vpack.c.bf16 %v271_v61, %v263_v59  ;;  %v343_v59 = vld [vmem:[#allocation7 + $0x528] sm:$0xff] }
 0x130   :  { %v1269_v16 = vmax.f32 %v172_v1, 0.0  ;;  %v1034_v1 = vpack.c.bf16 %v256_v56, %v248_v55  ;;  %v1036_v5 = vpack.c.bf16 %v273_v63, %v265_v62  ;;  %v328_v55 = vld [vmem:[#allocation7 + $0x4b0] sm:$0xff]  ;;  %v351_v61 = vld [vmem:[#allocation7 + $0x568] sm:$0xff]  ;;  %v345_v62 = vld [vmem:[#allocation7 + $0x538] sm:$0xff] }
 0x131   :  { %v177_v11 = vmax.f32 %v174_v6, 0.0  ;;  %v264_v6 = vld [vmem:[#allocation7 + $0x2b0] sm:$0xff]  ;;  %v353_v63 = vld [vmem:[#allocation7 + $0x578] sm:$0xff] }
 0x132   :  { %v336_v56 = vld [vmem:[#allocation7 + $0x4f0] sm:$0xff] }
 0x133   :  { %540 = vmatprep.mubr.f32.mxu1 %v177_v11  ;;  %611 = vmatprep.mubr.f32.mxu0 %v177_v11 }
 0x134   :  { %541 = vmatmul.mubr.f32.vlgmr.msra.gmra.mrb[0].mxu1 %v1269_v16  ;;  %612 = vmatmul.mubr.f32.vlgmr.msra.gmra.mrb[2].mxu0 %v1269_v16 }
 0x135   :  { %955 = vmatpush1.bf16.msra.mxu1 %v954_v12  ;;  %1019 = vmatpush1.bf16.msra.mxu0 %v1018_v13  ;;  %v974_v12 = vpack.c.bf16 %v270_v3, %v262_v2  ;;  %v1038_v13 = vpack.c.bf16 %v272_v7, %v264_v6  ;;  %v342_v2 = vld [vmem:[#allocation7 + $0x520] sm:$0xff]  ;;  %v344_v6 = vld [vmem:[#allocation7 + $0x530] sm:$0xff] }
 0x136   :  { %682 = vmatprep.mubr.f32.mxu1 %v177_v11  ;;  %753 = vmatprep.mubr.f32.mxu0 %v177_v11  ;;  %v289_v11 = vld [vmem:[#allocation7 + $0x378] sm:$0xff]  ;;  %v350_v3 = vld [vmem:[#allocation7 + $0x560] sm:$0xff]  ;;  %v352_v7 = vld [vmem:[#allocation7 + $0x570] sm:$0xff] }
 0x137   :  { %957 = vmatprep.subr.bf16.mxu1 %v956_v20  ;;  %1021 = vmatprep.subr.bf16.mxu0 %v1020_v21  ;;  %v1040_v18 = vpack.c.bf16 %v289_v11, %v281_v10  ;;  %v288_v20 = vld [vmem:[#allocation7 + $0x370] sm:$0xff]  ;;  %v295_v21 = vld [vmem:[#allocation7 + $0x3a8] sm:$0xff]  ;;  %v361_v10 = vld [vmem:[#allocation7 + $0x5b8] sm:$0xff] }
 0x138   :  { %v369_v11 = vld [vmem:[#allocation7 + $0x5f8] sm:$0xff] }
 0x139   :  { %959 = vmatpush1.bf16.msra.mxu1 %v958_v25  ;;  %1023 = vmatpush1.bf16.msra.mxu0 %v1022_v26  ;;  %v978_v25 = vpack.c.bf16 %v286_v15, %v278_v14  ;;  %v1042_v26 = vpack.c.bf16 %v288_v20, %v280_v19  ;;  %v358_v14 = vld [vmem:[#allocation7 + $0x5a0] sm:$0xff]  ;;  %v360_v19 = vld [vmem:[#allocation7 + $0x5b0] sm:$0xff] }
 0x13a   :  { %961 = vmatprep.subr.bf16.mxu1 %v960_v29  ;;  %1025 = vmatprep.subr.bf16.mxu0 %v1024_v30  ;;  %v980_v29 = vpack.c.bf16 %v303_v22, %v295_v21  ;;  %v1044_v30 = vpack.c.bf16 %v305_v24, %v297_v23  ;;  %v366_v15 = vld [vmem:[#allocation7 + $0x5e0] sm:$0xff]  ;;  %v368_v20 = vld [vmem:[#allocation7 + $0x5f0] sm:$0xff]  ;;  %v375_v21 = vld [vmem:[#allocation7 + $0x628] sm:$0xff] }
 0x13b   :  { %v383_v22 = vld [vmem:[#allocation7 + $0x668] sm:$0xff]  ;;  %v377_v23 = vld [vmem:[#allocation7 + $0x638] sm:$0xff] }
 0x13c   :  { %v385_v24 = vld [vmem:[#allocation7 + $0x678] sm:$0xff] }
 0x13d   :  { %963 = vmatpush1.bf16.msra.mxu1 %v962_v37  ;;  %1027 = vmatpush1.bf16.msra.mxu0 %v1026_v38  ;;  %v982_v37 = vpack.c.bf16 %v302_v28, %v294_v27  ;;  %v1046_v38 = vpack.c.bf16 %v304_v32, %v296_v31  ;;  %v374_v27 = vld [vmem:[#allocation7 + $0x620] sm:$0xff]  ;;  %v376_v31 = vld [vmem:[#allocation7 + $0x630] sm:$0xff] }
 0x13e   :  { %965 = vmatprep.subr.bf16.mxu1 %v964_v41  ;;  %1029 = vmatprep.subr.bf16.mxu0 %v1028_v42  ;;  %v984_v41 = vpack.c.bf16 %v319_v34, %v311_v33  ;;  %v1048_v42 = vpack.c.bf16 %v321_v36, %v313_v35  ;;  %v382_v28 = vld [vmem:[#allocation7 + $0x660] sm:$0xff]  ;;  %v384_v32 = vld [vmem:[#allocation7 + $0x670] sm:$0xff]  ;;  %v391_v33 = vld [vmem:[#allocation7 + $0x6a8] sm:$0xff] }
 0x13f   :  { %v399_v34 = vld [vmem:[#allocation7 + $0x6e8] sm:$0xff]  ;;  %v393_v35 = vld [vmem:[#allocation7 + $0x6b8] sm:$0xff] }
 0x140   :  { %v401_v36 = vld [vmem:[#allocation7 + $0x6f8] sm:$0xff] }
 0x141   :  { %967 = vmatpush1.bf16.msra.mxu1 %v966_v49  ;;  %1031 = vmatpush1.bf16.msra.mxu0 %v1030_v50  ;;  %v986_v49 = vpack.c.bf16 %v318_v40, %v310_v39  ;;  %v1050_v50 = vpack.c.bf16 %v320_v44, %v312_v43  ;;  %v390_v39 = vld [vmem:[#allocation7 + $0x6a0] sm:$0xff]  ;;  %v392_v43 = vld [vmem:[#allocation7 + $0x6b0] sm:$0xff] }
 0x142   :  { %969 = vmatprep.subr.bf16.mxu1 %v968_v53  ;;  %1033 = vmatprep.subr.bf16.mxu0 %v1032_v54  ;;  %v988_v53 = vpack.c.bf16 %v335_v46, %v327_v45  ;;  %v1052_v54 = vpack.c.bf16 %v337_v48, %v329_v47  ;;  %v398_v40 = vld [vmem:[#allocation7 + $0x6e0] sm:$0xff]  ;;  %v400_v44 = vld [vmem:[#allocation7 + $0x6f0] sm:$0xff]  ;;  %v407_v45 = vld [vmem:[#allocation7 + $0x728] sm:$0xff] }
 0x143   :  { %v415_v46 = vld [vmem:[#allocation7 + $0x768] sm:$0xff]  ;;  %v409_v47 = vld [vmem:[#allocation7 + $0x738] sm:$0xff] }
 0x144   :  { %v417_v48 = vld [vmem:[#allocation7 + $0x778] sm:$0xff] }
 0x145   :  { %971 = vmatpush1.bf16.msra.mxu1 %v970_v0  ;;  %1035 = vmatpush1.bf16.msra.mxu0 %v1034_v1  ;;  %v990_v0 = vpack.c.bf16 %v334_v52, %v326_v51  ;;  %v1054_v1 = vpack.c.bf16 %v336_v56, %v328_v55  ;;  %v406_v51 = vld [vmem:[#allocation7 + $0x720] sm:$0xff]  ;;  %v408_v55 = vld [vmem:[#allocation7 + $0x730] sm:$0xff] }
 0x146   :  { %973 = vmatprep.subr.bf16.mxu1 %v972_v4  ;;  %1037 = vmatprep.subr.bf16.mxu0 %v1036_v5  ;;  %v992_v4 = vpack.c.bf16 %v351_v61, %v343_v59  ;;  %v1056_v5 = vpack.c.bf16 %v353_v63, %v345_v62  ;;  %v414_v52 = vld [vmem:[#allocation7 + $0x760] sm:$0xff]  ;;  %v416_v56 = vld [vmem:[#allocation7 + $0x770] sm:$0xff]  ;;  %v423_v59 = vld [vmem:[#allocation7 + $0x7a8] sm:$0xff] }
 0x147   :  { %v431_v61 = vld [vmem:[#allocation7 + $0x7e8] sm:$0xff]  ;;  %v425_v62 = vld [vmem:[#allocation7 + $0x7b8] sm:$0xff] }
 0x148   :  { %v433_v63 = vld [vmem:[#allocation7 + $0x7f8] sm:$0xff] }
 0x149   :  { %975 = vmatpush1.bf16.msra.mxu1 %v974_v12  ;;  %1039 = vmatpush1.bf16.msra.mxu0 %v1038_v13  ;;  %v994_v12 = vpack.c.bf16 %v350_v3, %v342_v2  ;;  %v1058_v13 = vpack.c.bf16 %v352_v7, %v344_v6  ;;  %v422_v2 = vld [vmem:[#allocation7 + $0x7a0] sm:$0xff]  ;;  %v1012_v3 = vpack.c.bf16 %v431_v61, %v423_v59  ;;  %v424_v6 = vld [vmem:[#allocation7 + $0x7b0] sm:$0xff] }
 0x14a   :  { %977 = vmatprep.subr.bf16.mxu1 %v976_v17  ;;  %1041 = vmatprep.subr.bf16.mxu0 %v1040_v18  ;;  %v996_v17 = vpack.c.bf16 %v367_v9, %v359_v8  ;;  %v1060_v18 = vpack.c.bf16 %v369_v11, %v361_v10  ;;  %v432_v7 = vld [vmem:[#allocation7 + $0x7f0] sm:$0xff]  ;;  %v446_v10 = vsub.s32 2, %v1258_v57  ;;  %v434_v11 = vld [vmem:[%s1304_s4] sm:$0xff]  ;;  %s1191_s4 = smov [#allocation8]  }
 0x14b   :  { %v1078_v9 = vpack.c.bf16 %v432_v7, %v424_v6  ;;  %s782_s8 = sshll.u32 %s1191_s4, 4  ;;  %s783_s8 = int_to_ptr.vmem [resolvable:$true] %s782_s8 }
 0x14c   :  { %s1155_s9 = scalar_lea.vmem %s783_s8, 1024  ;;  %p1160_p11 = scmp.lt.s32.totalorder %s783_s8, %s783_s8 }
 0x14d   :  { %979 = vmatpush1.bf16.msra.mxu1 %v978_v25  ;;  %1043 = vmatpush1.bf16.msra.mxu0 %v1042_v26  ;;  %v998_v25 = vpack.c.bf16 %v366_v15, %v358_v14  ;;  %v1062_v26 = vpack.c.bf16 %v368_v20, %v360_v19  ;;  %v447_v14 = vrot.slane %v434_v11, %v446_v10  ;;  %p1156_p10 = scmp.ne.s32.totalorder %s783_s8, %s1155_s9  ;;  %p1161_p12 = scmp.lt.s32.totalorder %s1155_s9, %s1155_s9 }
 0x14e   :  { %981 = vmatprep.subr.bf16.mxu1 %v980_v29  ;;  %1045 = vmatprep.subr.bf16.mxu0 %v1044_v30  ;;  %v1000_v29 = vpack.c.bf16 %v383_v22, %v375_v21  ;;  %v1064_v30 = vpack.c.bf16 %v385_v24, %v377_v23  ;;  %v443_v15 = vrot.slane %v434_v11, %v101_v60  ;;  %v462_v60 = vsub.s32 6, %v1258_v57 }
 0x14f   :  { %p1162_p13 = por %p1161_p12, %p1160_p11 }
 0x151   :  { %983 = vmatpush1.bf16.msra.mxu1 %v982_v37  ;;  %1047 = vmatpush1.bf16.msra.mxu0 %v1046_v38  ;;  %v1002_v37 = vpack.c.bf16 %v382_v28, %v374_v27  ;;  %v1066_v38 = vpack.c.bf16 %v384_v32, %v376_v31  ;;  %v463_v32 = vrot.slane %v434_v11, %v462_v60  ;;  %p1163_p0 = pnand %p1162_p13, %p1156_p10 }
 0x152   :  { %985 = vmatprep.subr.bf16.mxu1 %v984_v41  ;;  %1049 = vmatprep.subr.bf16.mxu0 %v1048_v42  ;;  %v1004_v41 = vpack.c.bf16 %v399_v34, %v391_v33  ;;  %v1068_v42 = vpack.c.bf16 %v401_v36, %v393_v35 }
 0x155   :  { %987 = vmatpush1.bf16.msra.mxu1 %v986_v49  ;;  %1051 = vmatpush1.bf16.msra.mxu0 %v1050_v50  ;;  %v1006_v49 = vpack.c.bf16 %v398_v40, %v390_v39  ;;  %v1070_v50 = vpack.c.bf16 %v400_v44, %v392_v43 }
 0x156   :  { %989 = vmatprep.subr.bf16.mxu1 %v988_v53  ;;  %1053 = vmatprep.subr.bf16.mxu0 %v1052_v54  ;;  %v1008_v53 = vpack.c.bf16 %v415_v46, %v407_v45  ;;  %v1072_v54 = vpack.c.bf16 %v417_v48, %v409_v47 }
 0x159   :  { %991 = vmatpush1.bf16.msra.mxu1 %v990_v0  ;;  %1055 = vmatpush1.bf16.msra.mxu0 %v1054_v1  ;;  %v1010_v0 = vpack.c.bf16 %v414_v52, %v406_v51  ;;  %v1074_v1 = vpack.c.bf16 %v416_v56, %v408_v55 }
 0x15a   :  { %993 = vmatprep.subr.bf16.mxu1 %v992_v4  ;;  %1057 = vmatprep.subr.bf16.mxu0 %v1056_v5  ;;  %v1076_v4 = vpack.c.bf16 %v433_v63, %v425_v62  ;;  %v430_v5 = vld [vmem:[#allocation7 + $0x7e0] sm:$0xff] }
 0x15b   :  { %v1014_v8 = vpack.c.bf16 %v430_v5, %v422_v2 }
 0x15d   :  { %995 = vmatpush1.bf16.msra.mxu1 %v994_v12  ;;  %1059 = vmatpush1.bf16.msra.mxu0 %v1058_v13  ;;  %v450_v12 = vsub.s32 3, %v1258_v57  ;;  %v439_v13 = vrot.slane %v434_v11, %v97_v58  ;;  %v454_v58 = vsub.s32 4, %v1258_v57 }
 0x15e   :  { %997 = vmatprep.subr.bf16.mxu1 %v996_v17  ;;  %1061 = vmatprep.subr.bf16.mxu0 %v1060_v18 }
 0x15f   :  { %v451_v17 = vrot.slane %v434_v11, %v450_v12  ;;  %v455_v31 = vrot.slane %v434_v11, %v454_v58 }
 0x161   :  { %999 = vmatpush1.bf16.msra.mxu1 %v998_v25  ;;  %1063 = vmatpush1.bf16.msra.mxu0 %v1062_v26 }
 0x162   :  { %1001 = vmatprep.subr.bf16.mxu1 %v1000_v29  ;;  %1065 = vmatprep.subr.bf16.mxu0 %v1064_v30  ;;  %v458_v29 = vsub.s32 5, %v1258_v57  ;;  %v466_v30 = vsub.s32 7, %v1258_v57 }
 0x164   :  { %v459_v33 = vrot.slane %v434_v11, %v458_v29  ;;  %v467_v34 = vrot.slane %v434_v11, %v466_v30 }
 0x165   :  { %1003 = vmatpush1.bf16.msra.mxu1 %v1002_v37  ;;  %1067 = vmatpush1.bf16.msra.mxu0 %v1066_v38 }
 0x166   :  { %1005 = vmatprep.subr.bf16.mxu1 %v1004_v41  ;;  %1069 = vmatprep.subr.bf16.mxu0 %v1068_v42 }
 0x169   :  { %1007 = vmatpush1.bf16.msra.mxu1 %v1006_v49  ;;  %1071 = vmatpush1.bf16.msra.mxu0 %v1070_v50 }
 0x16a   :  { %1009 = vmatprep.subr.bf16.mxu1 %v1008_v53  ;;  %1073 = vmatprep.subr.bf16.mxu0 %v1072_v54 }
 0x16d   :  { %1011 = vmatpush1.bf16.msra.mxu1 %v1010_v0  ;;  %1075 = vmatpush1.bf16.msra.mxu0 %v1074_v1 }
 0x16e   :  { %1013 = vmatprep.subr.bf16.mxu1 %v1012_v3  ;;  %1077 = vmatprep.subr.bf16.mxu0 %v1076_v4 }
 0x171   :  { %1015 = vmatpush1.bf16.msra.mxu1 %v1014_v8  ;;  %1079 = vmatpush1.bf16.msra.mxu0 %v1078_v9 }
 0x174   :  { %683 = vmatmul.mubr.f32.vlgmr.msra.gmra.mrb[2].mxu1 %v1269_v16  ;;  %754 = vmatmul.mubr.f32.vlgmr.msra.gmra.mrb[4].mxu0 %v1269_v16 }
 0x207   :  { %v542_v18 = vpop.f32.mrb[0].mxu1  ;;  %v613_v19 = vpop.f32.mrb[2].mxu0 }
 0x208   :  { %v543_v20 = vadd.f32 %v542_v18, %v439_v13  ;;  %v614_v16 = vadd.f32 %v613_v19, %v447_v14  ;;  %v544_v21 = vpop.f32.mrb[1].mxu1  ;;  %v615_v22 = vpop.f32.mrb[3].mxu0 }
 0x209   :  { %v545_v23 = vadd.f32 %v544_v21, %v443_v15  ;;  %v616_v24 = vadd.f32 %v615_v22, %v451_v17 }
 0x20a   :  { %v760_v25 = vmax.f32 %v543_v20, 0.0  ;;  %v762_v26 = vmax.f32 %v614_v16, 0.0 }
 0x20b   :  { %v761_v27 = vmax.f32 %v545_v23, 0.0  ;;  %v763_v28 = vmax.f32 %v616_v24, 0.0 }
 0x20c   :  { %768 = vst [vmem:[#allocation8] sm:$0xff] %v760_v25  ;;  %770 = vst [vmem:[#allocation8 + $0x10] sm:$0xff] %v762_v26 }
 0x20d   :  { %769 = vst [vmem:[#allocation8 + $0x8] sm:$0xff] %v761_v27  ;;  %771 = vst [vmem:[#allocation8 + $0x18] sm:$0xff] %v763_v28 }
 0x247   :  { %v684_v35 = vpop.f32.mrb[2].mxu1  ;;  %v755_v36 = vpop.f32.mrb[4].mxu0 }
 0x248   :  { %v685_v37 = vadd.f32 %v684_v35, %v455_v31  ;;  %v756_v38 = vadd.f32 %v755_v36, %v463_v32  ;;  %v686_v39 = vpop.f32.mrb[3].mxu1  ;;  %v757_v40 = vpop.f32.mrb[5].mxu0 }
 0x249   :  { %v687_v41 = vadd.f32 %v686_v39, %v459_v33  ;;  %v758_v42 = vadd.f32 %v757_v40, %v467_v34 }
 0x24a   :  { %v764_v43 = vmax.f32 %v685_v37, 0.0  ;;  %v766_v44 = vmax.f32 %v756_v38, 0.0 }
 0x24b   :  { %v765_v45 = vmax.f32 %v687_v41, 0.0  ;;  %v767_v46 = vmax.f32 %v758_v42, 0.0 }
 0x24c   :  { %772 = vst [vmem:[#allocation8 + $0x20] sm:$0xff] %v764_v43  ;;  %774 = vst [vmem:[#allocation8 + $0x30] sm:$0xff] %v766_v44 }
 0x24d   :  { %773 = vst [vmem:[#allocation8 + $0x28] sm:$0xff] %v765_v45  ;;  %775 = vst [vmem:[#allocation8 + $0x38] sm:$0xff] %v767_v46 }
 0x24e   :  { %1166 = shalt.err (!%p1163_p0)
}
 0x24f   :  { %s1167_s12 = scalar_lea.hbm %s1305_s5, 1024 }
 0x250   :  { %p1168_p1 = scmp.ne.s32.totalorder %s1305_s5, %s1167_s12  ;;  %p1171_p2 = scmp.lt.u32.totalorder %s1167_s12, %s1305_s5 }
 0x252   :  { %p1173_p3 = pnand %p1171_p2, %p1168_p1 }
 0x254   :  { %1176 = shalt.err (!%p1173_p3)
}
 0x255   :  { %785 = dma.vmem_to_hbm [thread:$0]  %s783_s8, 1024, %s1305_s5, [#allocation4]  }
 0x256   :  { %1181 = dma.done.wait [#allocation4], 1024  }
 0x257   :  { %1182 = vsyncadd [#allocation4], 4294966272 }
 0x258   :  { %789 = vsyncpa [#allocation3], 1 }
 0x259   :  { %790 = vsyncpa [#allocation6], 1 }
 0x25a   :  { %791 = vsyncpa [#allocation4], 1 }

</bundles_post_ra>
